<compile_context>
chip_gen: v6e
topology: v6e:2x2x1
jax: 0.10.0
libtpu: 0.0.40
codegen_flags: <defaults>
</compile_context>

<pallas_src>
import jax
import jax.numpy as jnp
from jax.experimental import pallas as pl
from jax.experimental.pallas import tpu as pltpu


def _round_up(x, m):
    return ((x + m - 1) // m) * m


def res_layer_kernel(x_ref, w1t_ref, b1_ref, w2t_ref, b2_ref, o_ref):
    # x tile arrives in the compute dtype (bf16): MXU gets native bf16 operands,
    # accumulation is f32 via preferred_element_type.
    x = x_ref[...]

    # First linear + ReLU (MXU matmul, f32 accumulate; bias add in f32 on VPU).
    y = jnp.dot(x, w1t_ref[...], preferred_element_type=jnp.float32)
    y = jnp.maximum(y + b1_ref[...], 0.0)

    # Dropout: identity (eval mode).

    # Second linear + ReLU.
    y = jnp.dot(y.astype(w2t_ref.dtype), w2t_ref[...],
                preferred_element_type=jnp.float32)
    y = jnp.maximum(y + b2_ref[...], 0.0)

    # Residual add in f32, cast to output dtype (lane-dense store).
    o_ref[...] = (x.astype(jnp.float32) + y).astype(o_ref.dtype)


def res_layer(x, w1, b1, w2, b2, *, tile_m=256, compute_dtype=jnp.bfloat16):
    """ResLayer forward.

    x: [N, D]; w1/w2: [D, D] (PyTorch Linear layout: out x in); b1/b2: [D].
    Returns [N, D] in x.dtype.
    """
    N, D = x.shape
    out_dtype = x.dtype

    # Lane-dense feature dim: pad D up to a multiple of 128.
    Dp = max(_round_up(D, 128), 128)

    # Row tiling: big M tiles by default, clamped for small batches; pad N up to
    # a multiple of the tile (extra rows are sliced off afterwards).
    tm = min(tile_m, _round_up(N, 8))
    Np = _round_up(N, tm)
    grid = (Np // tm,)

    # Glue: pad + cast. Weights are pre-transposed so the kernel computes
    # x @ W^T directly on the MXU; padded rows/cols are zero so padded output
    # columns stay exactly zero through both linears and the residual.
    def pad2(a, rows, cols, dt):
        return jnp.zeros((rows, cols), dt).at[:a.shape[0], :a.shape[1]].set(
            a.astype(dt))

    x_p = pad2(x, Np, Dp, compute_dtype)
    w1t_p = pad2(w1.T, Dp, Dp, compute_dtype)
    w2t_p = pad2(w2.T, Dp, Dp, compute_dtype)
    b1_p = pad2(b1.reshape(1, D), 1, Dp, jnp.float32)
    b2_p = pad2(b2.reshape(1, D), 1, Dp, jnp.float32)

    itemsize = jnp.dtype(compute_dtype).itemsize
    bytes_accessed = (
        Np * Dp * itemsize                      # x streamed in
        + 2 * Dp * Dp * itemsize                # resident weights (read once)
        + 2 * Dp * 4                            # biases
        + Np * Dp * jnp.dtype(out_dtype).itemsize  # output streamed out
    )

    out_p = pl.pallas_call(
        res_layer_kernel,
        out_shape=jax.ShapeDtypeStruct((Np, Dp), out_dtype),
        grid_spec=pltpu.PrefetchScalarGridSpec(
            num_scalar_prefetch=0,
            grid=grid,
            in_specs=[
                pl.BlockSpec((tm, Dp), lambda i: (i, 0)),   # x tile (streamed)
                pl.BlockSpec((Dp, Dp), lambda i: (0, 0)),   # W1^T (resident)
                pl.BlockSpec((1, Dp), lambda i: (0, 0)),    # b1
                pl.BlockSpec((Dp, Dp), lambda i: (0, 0)),   # W2^T (resident)
                pl.BlockSpec((1, Dp), lambda i: (0, 0)),    # b2
            ],
            out_specs=pl.BlockSpec((tm, Dp), lambda i: (i, 0)),
        ),
        compiler_params=pltpu.CompilerParams(
            dimension_semantics=("parallel",),
            vmem_limit_bytes=64 * 1024 * 1024,
        ),
        cost_estimate=pl.CostEstimate(
            flops=4 * Np * Dp * Dp,
            transcendentals=0,
            bytes_accessed=bytes_accessed,
        ),
    )(x_p, w1t_p, b1_p, w2t_p, b2_p)

    # Slice away row / feature padding.
    return out_p[:N, :D]


def res_layer_ref(x, w1, b1, w2, b2):
    """Pure-JAX f32 reference (eval-mode dropout)."""
    y = jnp.maximum(x @ w1.T + b1, 0.0)
    y = jnp.maximum(y @ w2.T + b2, 0.0)
    return x + y


if __name__ == "__main__":
    key = jax.random.PRNGKey(0)
    N, D = 16, 32  # batch rows, linear_size (hidden)

    kx, k1, kb1, k2, kb2 = jax.random.split(key, 5)
    x = jax.random.normal(kx, (N, D), dtype=jnp.float32)

    # Deterministic "PyTorch-like" init: U(-1/sqrt(D), 1/sqrt(D)).
    bound = 1.0 / (D ** 0.5)
    w1 = jax.random.uniform(k1, (D, D), jnp.float32, -bound, bound)
    b1 = jax.random.uniform(kb1, (D,), jnp.float32, -bound, bound)
    w2 = jax.random.uniform(k2, (D, D), jnp.float32, -bound, bound)
    b2 = jax.random.uniform(kb2, (D,), jnp.float32, -bound, bound)

    out = res_layer(x, w1, b1, w2, b2)
    out = jax.block_until_ready(out)

    ref = res_layer_ref(x, w1, b1, w2, b2)
    assert out.shape == (N, D)
    # bf16 MXU operands with f32 accumulation -> compare against the f32
    # reference with a tolerance appropriate for bf16 inputs.
    assert jnp.allclose(out, ref, atol=5e-2, rtol=5e-2), "mismatch vs reference"

    print("KERNEL_OK")
</pallas_src>

<mosaic_0001>
module attributes {stable_mosaic.version = 11 : i64} {
  func.func @res_layer_kernel(%arg0: i32, %arg1: memref<16x128xbf16, #tpu.memory_space<vmem>>, %arg2: memref<128x128xbf16, #tpu.memory_space<vmem>>, %arg3: memref<1x128xf32, #tpu.memory_space<vmem>>, %arg4: memref<128x128xbf16, #tpu.memory_space<vmem>>, %arg5: memref<1x128xf32, #tpu.memory_space<vmem>>, %arg6: memref<16x128xf32, #tpu.memory_space<vmem>>) attributes {dimension_semantics = [#tpu.dimension_semantics<parallel>], iteration_bounds = array<i64: 1>, scalar_prefetch = 0 : i64, scratch_operands = 0 : i64, tpu.core_type = #tpu.core_type<tc>, window_params = [{transform_indices = @transform_0, window_bounds = array<i64: 16, 128>}, {pipeline_mode = #tpu.pipeline_mode<synchronous>, transform_indices = @transform_1, window_bounds = array<i64: 128, 128>}, {pipeline_mode = #tpu.pipeline_mode<synchronous>, transform_indices = @transform_2, window_bounds = array<i64: 1, 128>}, {pipeline_mode = #tpu.pipeline_mode<synchronous>, transform_indices = @transform_3, window_bounds = array<i64: 128, 128>}, {pipeline_mode = #tpu.pipeline_mode<synchronous>, transform_indices = @transform_4, window_bounds = array<i64: 1, 128>}, {transform_indices = @transform_5, window_bounds = array<i64: 16, 128>}]} {
    %c0 = arith.constant 0 : index
    %c0_0 = arith.constant 0 : index
    %0 = vector.load %arg1[%c0, %c0_0] : memref<16x128xbf16, #tpu.memory_space<vmem>>, vector<16x128xbf16>
    %c0_1 = arith.constant 0 : index
    %c0_2 = arith.constant 0 : index
    %1 = vector.load %arg2[%c0_1, %c0_2] : memref<128x128xbf16, #tpu.memory_space<vmem>>, vector<128x128xbf16>
    %cst = arith.constant dense<0.000000e+00> : vector<16x128xf32>
    %2 = tpu.matmul %0, %1, %cst {dimension_numbers = #tpu.dot_dimension_numbers<[1], [0], [0], [1], [0, 0, 1, 1], [], []>} : vector<16x128xbf16>, vector<128x128xbf16>, vector<16x128xf32> -> vector<16x128xf32>
    %c0_3 = arith.constant 0 : index
    %c0_4 = arith.constant 0 : index
    %3 = vector.load %arg3[%c0_3, %c0_4] : memref<1x128xf32, #tpu.memory_space<vmem>>, vector<1x128xf32>
    %4 = vector.broadcast %3 : vector<1x128xf32> to vector<16x128xf32>
    %5 = arith.addf %2, %4 : vector<16x128xf32>
    %cst_5 = arith.constant 0.000000e+00 : f32
    %6 = vector.broadcast %cst_5 : f32 to vector<16x128xf32>
    %7 = arith.maximumf %5, %6 : vector<16x128xf32>
    %8 = arith.truncf %7 : vector<16x128xf32> to vector<16x128xbf16>
    %c0_6 = arith.constant 0 : index
    %c0_7 = arith.constant 0 : index
    %9 = vector.load %arg4[%c0_6, %c0_7] : memref<128x128xbf16, #tpu.memory_space<vmem>>, vector<128x128xbf16>
    %cst_8 = arith.constant dense<0.000000e+00> : vector<16x128xf32>
    %10 = tpu.matmul %8, %9, %cst_8 {dimension_numbers = #tpu.dot_dimension_numbers<[1], [0], [0], [1], [0, 0, 1, 1], [], []>} : vector<16x128xbf16>, vector<128x128xbf16>, vector<16x128xf32> -> vector<16x128xf32>
    %c0_9 = arith.constant 0 : index
    %c0_10 = arith.constant 0 : index
    %11 = vector.load %arg5[%c0_9, %c0_10] : memref<1x128xf32, #tpu.memory_space<vmem>>, vector<1x128xf32>
    %12 = vector.broadcast %11 : vector<1x128xf32> to vector<16x128xf32>
    %13 = arith.addf %10, %12 : vector<16x128xf32>
    %cst_11 = arith.constant 0.000000e+00 : f32
    %14 = vector.broadcast %cst_11 : f32 to vector<16x128xf32>
    %15 = arith.maximumf %13, %14 : vector<16x128xf32>
    %16 = arith.extf %0 : vector<16x128xbf16> to vector<16x128xf32>
    %17 = arith.addf %16, %15 : vector<16x128xf32>
    %c0_12 = arith.constant 0 : index
    %c0_13 = arith.constant 0 : index
    %18 = vector.load %arg6[%c0_12, %c0_13] : memref<16x128xf32, #tpu.memory_space<vmem>>, vector<16x128xf32>
    tpu.vector_store %arg6[%c0_12, %c0_13], %17 {strides = array<i32>} : memref<16x128xf32, #tpu.memory_space<vmem>>, vector<16x128xf32>,
    return
  }
  func.func @transform_0(%arg0: i32) -> (i32, i32) {
    %c0_i32 = arith.constant 0 : i32
    %c0_i32_0 = arith.constant 0 : i32
    return %arg0, %c0_i32 : i32, i32
  }
  func.func @transform_1(%arg0: i32) -> (i32, i32) {
    %c0_i32 = arith.constant 0 : i32
    %c0_i32_0 = arith.constant 0 : i32
    %c0_i32_1 = arith.constant 0 : i32
    return %c0_i32, %c0_i32_0 : i32, i32
  }
  func.func @transform_2(%arg0: i32) -> (i32, i32) {
    %c0_i32 = arith.constant 0 : i32
    %c0_i32_0 = arith.constant 0 : i32
    %c0_i32_1 = arith.constant 0 : i32
    return %c0_i32, %c0_i32_0 : i32, i32
  }
  func.func @transform_3(%arg0: i32) -> (i32, i32) {
    %c0_i32 = arith.constant 0 : i32
    %c0_i32_0 = arith.constant 0 : i32
    %c0_i32_1 = arith.constant 0 : i32
    return %c0_i32, %c0_i32_0 : i32, i32
  }
  func.func @transform_4(%arg0: i32) -> (i32, i32) {
    %c0_i32 = arith.constant 0 : i32
    %c0_i32_0 = arith.constant 0 : i32
    %c0_i32_1 = arith.constant 0 : i32
    return %c0_i32, %c0_i32_0 : i32, i32
  }
  func.func @transform_5(%arg0: i32) -> (i32, i32) {
    %c0_i32 = arith.constant 0 : i32
    %c0_i32_0 = arith.constant 0 : i32
    return %arg0, %c0_i32 : i32, i32
  }
}

</mosaic_0001>

<bundles_post_ra>
// kernel: tpu_custom_call.1
= control target key start
LH: loop header
LB: loop body
LE: loop exit
PB: predicated region body
PF: predicated region fallthrough
CT: control target
= control target key end

     0   :  { %10 = vsyncpa [#allocation3], 0  ;;  %s573_s0 = inlined_call_operand.hbm [shape: bf16[16,128], index: 0, kind: input, shape index: {}]   ;;  %s574_s1 = inlined_call_operand.hbm [shape: bf16[128,128], index: 1, kind: input, shape index: {}]   ;;  %s575_s2 = inlined_call_operand.vmem [shape: f32[1,128], index: 2, kind: input, shape index: {}]   ;;  %s576_s3 = inlined_call_operand.hbm [shape: bf16[128,128], index: 3, kind: input, shape index: {}]   ;;  %s577_s4 = inlined_call_operand.vmem [shape: f32[1,128], index: 4, kind: input, shape index: {}]   ;;  %s578_s5 = inlined_call_operand.hbm [shape: f32[16,128], index: 5, kind: output, shape index: {}]  }
   0x1   :  { %11 = vsyncpa [#allocation6], 0 }
   0x2   :  { %12 = vsyncpa [#allocation4], 0  ;;  %s515_s18 = smov [#allocation5]   ;;  %s516_s20 = smov [#allocation2]  }
   0x3   :  { %s30_s19 = sshll.u32 %s515_s18, 4  ;;  %s18_s21 = sshll.u32 %s516_s20, 4  ;;  %s31_s19 = int_to_ptr.vmem [resolvable:$true] %s30_s19  ;;  %s19_s21 = int_to_ptr.vmem [resolvable:$true] %s18_s21 }
   0x4   :  { %s437_s22 = scalar_lea.vmem %s31_s19, 1024  ;;  %p442_p1 = scmp.lt.s32.totalorder %s31_s19, %s31_s19 }
   0x5   :  { %p438_p0 = scmp.ne.s32.totalorder %s31_s19, %s437_s22  ;;  %p443_p2 = scmp.lt.s32.totalorder %s437_s22, %s437_s22 }
   0x7   :  { %p444_p3 = por %p443_p2, %p442_p1 }
   0x9   :  { %p445_p4 = pnand %p444_p3, %p438_p0 }
   0xb   :  { %448 = shalt.err (!%p445_p4)
}
   0xc   :  { %s517_s23 = smov 64   ;;  %s518_s24 = smov 4  }
   0xd   :  { %36 = dma.hbm_to_vmem [thread:$0]  %s574_s1, 1024, %s31_s19, [#allocation6], %s517_s23, %s517_s23, %s518_s24  }
   0xe   :  { %s457_s27 = scalar_lea.vmem %s19_s21, 128  ;;  %p462_p6 = scmp.lt.s32.totalorder %s19_s21, %s19_s21 }
   0xf   :  { %p458_p5 = scmp.ne.s32.totalorder %s19_s21, %s457_s27  ;;  %p463_p7 = scmp.lt.s32.totalorder %s457_s27, %s457_s27 }
  0x11   :  { %p464_p8 = por %p463_p7, %p462_p6 }
  0x13   :  { %p465_p9 = pnand %p464_p8, %p458_p5 }
  0x15   :  { %468 = shalt.err (!%p465_p9)
}
  0x16   :  { %24 = dma.hbm_to_vmem [thread:$0]  %s573_s0, 128, %s19_s21, [#allocation3], %s517_s23, %s517_s23, %s518_s24  }
  0x17   :  { %s519_s30 = smov [#allocation7]  }
  0x18   :  { %s44_s6 = sshll.u32 %s519_s30, 4  ;;  %s45_s6 = int_to_ptr.vmem [resolvable:$true] %s44_s6 }
  0x19   :  { %s477_s7 = scalar_lea.vmem %s45_s6, 1024  ;;  %p482_p11 = scmp.lt.s32.totalorder %s45_s6, %s45_s6 }
  0x1a   :  { %p478_p10 = scmp.ne.s32.totalorder %s45_s6, %s477_s7  ;;  %p483_p12 = scmp.lt.s32.totalorder %s477_s7, %s477_s7 }
  0x1c   :  { %p484_p13 = por %p483_p12, %p482_p11 }
  0x1e   :  { %p485_p0 = pnand %p484_p13, %p478_p10 }
  0x20   :  { %488 = shalt.err (!%p485_p0)
}
  0x21   :  { %50 = dma.hbm_to_vmem [thread:$0]  %s576_s3, 1024, %s45_s6, [#allocation6], %s517_s23, %s517_s23, %s518_s24  }
  0x22   :  { %509 = dma.done.wait [#allocation3], 128  }
  0x23   :  { %510 = vsyncadd [#allocation3], 4294967168 }
  0x24   :  { %511 = dma.done.wait [#allocation6], 2048  }
  0x25   :  { %512 = vsyncadd [#allocation6], 4294965248  ;;  %v520_v0 = vmov 0.0   ;;  %vm521_vm0 = vmmov 0   ;;  %v411_v1 = vld [vmem:[#allocation5 + $0x38] sm:$0xff]   ;;  %v412_v2 = vld [vmem:[#allocation5 + $0x30] sm:$0xff]  }
  0x26   :  { %361 = vmatprep.subr.bf16.mxu0 %v520_v0  ;;  %377 = vmatprep.mubr.msk.bf16.mxu0 %vm521_vm0, %v520_v0  ;;  %v413_v3 = vld [vmem:[#allocation5 + $0x28] sm:$0xff]   ;;  %v420_v4 = vld [vmem:[#allocation7 + $0x38] sm:$0xff]   ;;  %v414_v5 = vld [vmem:[#allocation5 + $0x20] sm:$0xff]  }
  0x27   :  { %381 = vmatprep.subr.bf16.mxu1 %v520_v0  ;;  %397 = vmatprep.mubr.msk.bf16.mxu1 %vm521_vm0, %v520_v0  ;;  %v421_v6 = vld [vmem:[#allocation7 + $0x30] sm:$0xff]   ;;  %v415_v7 = vld [vmem:[#allocation5 + $0x18] sm:$0xff]   ;;  %v422_v8 = vld [vmem:[#allocation7 + $0x28] sm:$0xff]  }
  0x28   :  { %362 = vmatpush3.bf16.msra.mxu0 %v411_v1  ;;  %382 = vmatpush3.bf16.msra.mxu1 %v420_v4  ;;  %v416_v9 = vld [vmem:[#allocation5 + $0x10] sm:$0xff]   ;;  %v423_v10 = vld [vmem:[#allocation7 + $0x20] sm:$0xff]   ;;  %v417_v11 = vld [vmem:[#allocation5 + $0x8] sm:$0xff]  }
  0x29   :  { %363 = vmatprep.subr.bf16.mxu0 %v520_v0  ;;  %383 = vmatprep.subr.bf16.mxu1 %v520_v0  ;;  %v424_v12 = vld [vmem:[#allocation7 + $0x18] sm:$0xff]   ;;  %v418_v13 = vld [vmem:[#allocation5] sm:$0xff]   ;;  %v425_v15 = vld [vmem:[#allocation7 + $0x10] sm:$0xff]  }
  0x2a   :  { %v63_v14 = vld [vmem:[#allocation2] sm:$0xff]   ;;  %v426_v16 = vld [vmem:[#allocation7 + $0x8] sm:$0xff]   ;;  %v427_v17 = vld [vmem:[#allocation7] sm:$0xff]  }
  0x2b   :  { %v324_v18 = vld [vmem:[%s575_s2] ss:$0 sm:$0xff]  ;;  %v300_v31 = vunpack.c.l.bf16 %v63_v14  ;;  %v301_v37 = vunpack.c.h.bf16 %v63_v14  ;;  %s522_s2 = smov [#allocation8]  }
  0x2c   :  { %364 = vmatpush3.bf16.msra.mxu0 %v412_v2  ;;  %384 = vmatpush3.bf16.msra.mxu1 %v421_v6  ;;  %v334_v28 = vld [vmem:[%s577_s4] ss:$0 sm:$0xff]  ;;  %s311_s11 = sshll.u32 %s522_s2, 4  ;;  %s312_s11 = int_to_ptr.vmem [resolvable:$true] %s311_s11 }
  0x2d   :  { %365 = vmatprep.subr.bf16.mxu0 %v520_v0  ;;  %385 = vmatprep.subr.bf16.mxu1 %v520_v0  ;;  %s489_s12 = scalar_lea.vmem %s312_s11, 256  ;;  %p494_p2 = scmp.lt.s32.totalorder %s312_s11, %s312_s11 }
  0x2e   :  { %p490_p1 = scmp.ne.s32.totalorder %s312_s11, %s489_s12  ;;  %p495_p3 = scmp.lt.s32.totalorder %s489_s12, %s489_s12 }
  0x30   :  { %366 = vmatpush3.bf16.msra.mxu0 %v413_v3  ;;  %386 = vmatpush3.bf16.msra.mxu1 %v422_v8  ;;  %p496_p4 = por %p495_p3, %p494_p2 }
  0x31   :  { %367 = vmatprep.subr.bf16.mxu0 %v520_v0  ;;  %387 = vmatprep.subr.bf16.mxu1 %v520_v0 }
  0x32   :  { %p497_p5 = pnand %p496_p4, %p490_p1 }
  0x34   :  { %368 = vmatpush3.bf16.msra.mxu0 %v414_v5  ;;  %388 = vmatpush3.bf16.msra.mxu1 %v423_v10 }
  0x35   :  { %369 = vmatprep.subr.bf16.mxu0 %v520_v0  ;;  %389 = vmatprep.subr.bf16.mxu1 %v520_v0 }
  0x38   :  { %370 = vmatpush3.bf16.msra.mxu0 %v415_v7  ;;  %390 = vmatpush3.bf16.msra.mxu1 %v424_v12 }
  0x39   :  { %371 = vmatprep.subr.bf16.mxu0 %v520_v0  ;;  %391 = vmatprep.subr.bf16.mxu1 %v520_v0 }
  0x3c   :  { %372 = vmatpush3.bf16.msra.mxu0 %v416_v9  ;;  %392 = vmatpush3.bf16.msra.mxu1 %v425_v15 }
  0x3d   :  { %373 = vmatprep.subr.bf16.mxu0 %v520_v0  ;;  %393 = vmatprep.subr.bf16.mxu1 %v520_v0 }
  0x40   :  { %374 = vmatpush3.bf16.msra.mxu0 %v417_v11  ;;  %394 = vmatpush3.bf16.msra.mxu1 %v426_v16 }
  0x41   :  { %375 = vmatprep.subr.bf16.mxu0 %v520_v0  ;;  %395 = vmatprep.subr.bf16.mxu1 %v520_v0 }
  0x44   :  { %376 = vmatpush3.bf16.msra.mxu0 %v418_v13  ;;  %396 = vmatpush3.bf16.msra.mxu1 %v427_v17 }
  0x47   :  { %378 = vmatmul.mubr.bf16.vlgmr.msra.gmra.mxu0 %v63_v14 }
 0x107   :  { %v176_v19 = vpop.f32.mrf.mxu0 }
 0x108   :  { %v177_v21 = vadd.f32 %v324_v18, %v176_v19 }
 0x109   :  { %v379_v20 = vpop.f32.mrf.mxu0 }
 0x10a   :  { %v183_v25 = vmax.f32 %v177_v21, 0.0 }
 0x10b   :  { %v179_v22 = vpop.f32.mrf.mxu0 }
 0x10c   :  { %v180_v23 = vadd.f32 %v324_v18, %v179_v22 }
 0x10d   :  { %v380_v24 = vpop.f32.mrf.mxu0 }
 0x10e   :  { %v184_v26 = vmax.f32 %v180_v23, 0.0 }
 0x110   :  { %v185_v27 = vpack.c.bf16 %v184_v26, %v183_v25 }
 0x112   :  { %398 = vmatmul.mubr.bf16.vlgmr.msra.gmra.mxu1 %v185_v27 }
 0x1d2   :  { %v291_v29 = vpop.f32.mrf.mxu1 }
 0x1d3   :  { %v292_v30 = vadd.f32 %v334_v28, %v291_v29 }
 0x1d4   :  { %v399_v32 = vpop.f32.mrf.mxu1 }
 0x1d5   :  { %v298_v33 = vmax.f32 %v292_v30, 0.0 }
 0x1d6   :  { %v294_v34 = vpop.f32.mrf.mxu1 }
 0x1d7   :  { %v302_v35 = vadd.f32 %v300_v31, %v298_v33  ;;  %v295_v36 = vadd.f32 %v334_v28, %v294_v34 }
 0x1d8   :  { %v400_v38 = vpop.f32.mrf.mxu1 }
 0x1d9   :  { %304 = vst [vmem:[#allocation8] sm:$0xff] %v302_v35  ;;  %v299_v39 = vmax.f32 %v295_v36, 0.0 }
 0x1db   :  { %v303_v40 = vadd.f32 %v301_v37, %v299_v39 }
 0x1dd   :  { %305 = vst [vmem:[#allocation8 + $0x8] sm:$0xff] %v303_v40 }
 0x1de   :  { %500 = shalt.err (!%p497_p5)
}
 0x1df   :  { %s523_s4 = smov 128   ;;  %s524_s13 = smov 8  }
 0x1e0   :  { %317 = dma.vmem_to_hbm [thread:$0]  %s312_s11, 256, %s578_s5, [#allocation4], %s523_s4, %s523_s4, %s524_s13  }
 0x1e1   :  { %513 = dma.done.wait [#allocation4], 256  }
 0x1e2   :  { %514 = vsyncadd [#allocation4], 4294967040 }
 0x1e3   :  { %321 = vsyncpa [#allocation3], 1 }
 0x1e4   :  { %322 = vsyncpa [#allocation6], 1 }
 0x1e5   :  { %323 = vsyncpa [#allocation4], 1 }

</bundles_post_ra>
